<compile_context>
chip_gen: v7x
topology: tpu7x:2x2x1
jax: 0.10.0
libtpu: 0.0.40
codegen_flags: <defaults>
</compile_context>

<pallas_src>
import jax
import jax.numpy as jnp
from jax.experimental import pallas as pl
from jax.experimental.pallas import tpu as pltpu


LANE = 128   # TPU lane width


# ----------------------------------------------------------------------------
# Host-side helpers
# ----------------------------------------------------------------------------
def _round_up(n: int, m: int) -> int:
    return (n + m - 1) // m * m


def avg_pool_matrix(L: int, k: int) -> jnp.ndarray:
    """(L, L) operator A s.t. x @ A == replicate-pad + AvgPool1d(k, stride=1)."""
    p = (k - 1) // 2
    idx = jnp.arange(L)[:, None] + jnp.arange(k)[None, :] - p      # (L_out, k)
    idx = jnp.clip(idx, 0, L - 1)
    onehot = jax.nn.one_hot(idx, L, dtype=jnp.float32)             # (L_out, k, L_in)
    return onehot.sum(axis=1).T / float(k)                         # (L_in, L_out)


def decompose_sizes(input_length: int):
    trend_size = input_length // 4
    if trend_size % 2 == 0:
        trend_size += 1
    ssnl_size = trend_size // 2
    if ssnl_size % 2 == 0:
        ssnl_size += 1
    return max(3, trend_size), max(3, ssnl_size)


def make_linear(key, in_f, out_f):
    kw, kb = jax.random.split(key)
    bound = 1.0 / (in_f ** 0.5)
    # stored pre-transposed: (in_f, out_f) so the forward does x @ W + b
    W = jax.random.uniform(kw, (in_f, out_f), jnp.float32, -bound, bound)
    b = jax.random.uniform(kb, (out_f,), jnp.float32, -bound, bound)
    return W, b


def build_folded_slabs(params, A_t, A_s, seq_len, pred_len, d_model):
    """Fold the decomposition + linear stack into 3 lane-dense (.,128) matrices.

    Returns (w_slab bf16, b_slab f32, offsets) where offsets[name] = (row, rows).
    """
    (wx1, bx1, wx2, bx2, wm1, bm1, wm2, bm2,
     ws1, bs1, ws2, bs2, wo1, bo1, wo2, bo2) = params
    C = d_model * 2          # out_channels
    C4 = C // 4
    L = seq_len
    n1 = C + 2 * C4          # 48 active lanes after stage 1: [x1 | s1 | m1]
    f32 = jnp.float32

    I_L = jnp.eye(L, dtype=f32)
    R_t = I_L - A_t

    # --- series decomposition folded into the stage-1 weights -------------
    Wx1p = R_t @ (I_L - A_s) @ wx1      # residual branch   (L, C)
    Ws1p = R_t @ A_s @ ws1              # seasonal branch   (L, C4)
    Wm1p = A_t @ wm1                    # trend branch      (L, C4)

    # --- stage 1: z1 = relu(x @ W1 + b1), lanes [x1 0:C | s1 C:C+C4 | m1 ...] -
    W1 = jnp.zeros((L, LANE), f32)
    W1 = W1.at[:, 0:C].set(Wx1p).at[:, C:C + C4].set(Ws1p).at[:, C + C4:n1].set(Wm1p)
    b1 = jnp.zeros((LANE,), f32)
    b1 = b1.at[0:C].set(bx1).at[C:C + C4].set(bs1).at[C + C4:n1].set(bm1)

    # --- stage 2: h = relu(z1 @ Whead + bhead) -----------------------------
    #   lanes 0:C        -> relu((x1@wx2 + s1@ws2 + bx2+bs2) @ wo1 + bo1)
    #   lanes C+C4:n1    -> m1 (identity pass-through; relu is a no-op, m1 >= 0)
    Whead = jnp.zeros((LANE, LANE), f32)
    Whead = Whead.at[0:C, 0:C].set(wx2 @ wo1)
    Whead = Whead.at[C:C + C4, 0:C].set(ws2 @ wo1)
    Whead = Whead.at[C + C4:n1, C + C4:n1].set(jnp.eye(C4, dtype=f32))
    bhead = jnp.zeros((LANE,), f32).at[0:C].set((bx2 + bs2) @ wo1 + bo1)

    # --- stage 3: out = h @ Wfin + bfin (l_o2 and l_m2 stacked) ------------
    Wfin = jnp.zeros((LANE, LANE), f32)
    Wfin = Wfin.at[0:C, 0:pred_len].set(wo2)
    Wfin = Wfin.at[C + C4:n1, 0:pred_len].set(wm2)
    bfin = jnp.zeros((LANE,), f32).at[0:pred_len].set(bo2 + bm2)

    # --- pack weights into ONE bf16 slab (single DMA, static 16-row views) -
    L_pad = _round_up(L, 16)
    W1_pad = jnp.zeros((L_pad, LANE), f32).at[:L].set(W1)
    w_slab = jnp.concatenate([W1_pad, Whead, Wfin], axis=0).astype(jnp.bfloat16)
    offs = {"w1": (0, L), "whead": (L_pad, LANE), "wfin": (L_pad + LANE, LANE)}

    # --- biases stay f32 in a tiny (8, 128) slab (precision, cheap) --------
    b_slab = jnp.zeros((8, LANE), f32).at[0].set(b1).at[1].set(bhead).at[2].set(bfin)
    return w_slab, b_slab, offs


# ----------------------------------------------------------------------------
# Pallas kernel: 3 lane-dense matmuls, f32 bias/relu, one unmasked f32 store
# ----------------------------------------------------------------------------
def make_kernel(offs):
    r1, n1 = offs["w1"]
    r2, n2 = offs["whead"]
    r3, n3 = offs["wfin"]

    def kernel(x_ref, w_ref, b_ref, out_ref):
        f32 = jnp.float32
        bf16 = jnp.bfloat16
        x = x_ref[...].astype(bf16)                                   # (BM, L)

        # stage 1: fused [x1 | s1 | m1] (decomposition folded into weights)
        z1 = jnp.dot(x, w_ref[r1:r1 + n1, :], preferred_element_type=f32)
        z1 = jnp.maximum(z1 + b_ref[0:1, :], 0.0)

        # stage 2: fused output head + m1 identity pass-through
        h = jnp.dot(z1.astype(bf16), w_ref[r2:r2 + n2, :],
                    preferred_element_type=f32)
        h = jnp.maximum(h + b_ref[1:2, :], 0.0)

        # stage 3: fused final projection (l_o2 and l_m2 stacked), lane-dense store
        out = jnp.dot(h.astype(bf16), w_ref[r3:r3 + n3, :],
                      preferred_element_type=f32)
        out_ref[...] = (out + b_ref[2:3, :]).astype(out_ref.dtype)

    return kernel


def decom_linear_forward(x, w_slab, b_slab, offs, pred_len, block_b=None):
    """x: (B, seq_len) f32.  Returns (B, pred_len) f32."""
    B, L = x.shape
    if block_b is None:
        # whole batch in one grid step when it fits comfortably; 1024-row
        # tiles (still < 1 MiB of VMEM) only for very large batches.
        block_b = _round_up(B, 8) if B <= 1024 else 1024
    BM = block_b
    n_tiles = pl.cdiv(B, BM)
    B_pad = n_tiles * BM
    if B_pad != B:
        x = jnp.pad(x, ((0, B_pad - B), (0, 0)))

    flops = 2 * B_pad * (L * LANE + LANE * LANE + LANE * LANE)
    bytes_accessed = (B_pad * L * 4 + B_pad * LANE * 4
                      + w_slab.size * 2 + b_slab.size * 4)

    out_pad = pl.pallas_call(
        make_kernel(offs),
        out_shape=jax.ShapeDtypeStruct((B_pad, LANE), jnp.float32),
        grid=(n_tiles,),
        in_specs=[
            pl.BlockSpec((BM, L), lambda i: (i, 0)),
            # weight/bias slabs: constant block index -> fetched once and kept
            # resident across grid steps (no per-step re-DMA).
            pl.BlockSpec(w_slab.shape, lambda i: (0, 0)),
            pl.BlockSpec(b_slab.shape, lambda i: (0, 0)),
        ],
        out_specs=pl.BlockSpec((BM, LANE), lambda i: (i, 0)),
        compiler_params=pltpu.CompilerParams(
            dimension_semantics=("parallel",)),
        cost_estimate=pl.CostEstimate(flops=flops, transcendentals=0,
                                      bytes_accessed=bytes_accessed),
    )(x, w_slab, b_slab)
    return out_pad[:B, :pred_len]


# ----------------------------------------------------------------------------
# References
# ----------------------------------------------------------------------------
def reference_forward(x, A_t, A_s, params):
    """Exact f32 semantics of the original PyTorch module (2-D input path)."""
    (wx1, bx1, wx2, bx2, wm1, bm1, wm2, bm2,
     ws1, bs1, ws2, bs2, wo1, bo1, wo2, bo2) = params
    trend = x @ A_t
    x_ = x - trend
    seasonal = x_ @ A_s
    res = x_ - seasonal
    x1 = jnp.maximum(res @ wx1 + bx1, 0.0)
    x2 = x1 @ wx2 + bx2
    m1 = jnp.maximum(trend @ wm1 + bm1, 0.0)
    m2 = m1 @ wm2 + bm2
    s1 = jnp.maximum(seasonal @ ws1 + bs1, 0.0)
    s2 = s1 @ ws2 + bs2
    o = jnp.maximum((x2 + s2) @ wo1 + bo1, 0.0)
    return o @ wo2 + bo2 + m2


def folded_reference(x, w_slab, b_slab, offs, pred_len):
    """Plain-jnp mirror of the folded bf16 kernel math (tight plumbing check)."""
    f32, bf16 = jnp.float32, jnp.bfloat16
    r1, n1 = offs["w1"]
    r2, n2 = offs["whead"]
    r3, n3 = offs["wfin"]
    xb = x.astype(bf16)
    z1 = jnp.maximum(jnp.dot(xb, w_slab[r1:r1 + n1],
                             preferred_element_type=f32) + b_slab[0], 0.0)
    h = jnp.maximum(jnp.dot(z1.astype(bf16), w_slab[r2:r2 + n2],
                            preferred_element_type=f32) + b_slab[1], 0.0)
    out = jnp.dot(h.astype(bf16), w_slab[r3:r3 + n3],
                  preferred_element_type=f32) + b_slab[2]
    return out[:, :pred_len]


# ----------------------------------------------------------------------------
if __name__ == "__main__":
    # configs: seq_len=16, pred_len=8, d_model=16 -> out_channels=32
    seq_len, pred_len, d_model = 16, 8, 16
    C = d_model * 2          # 32
    C4 = C // 4              # 8
    B = 32

    key = jax.random.PRNGKey(0)
    keys = jax.random.split(key, 9)

    x = jax.random.normal(keys[0], (B, seq_len), jnp.float32)

    wx1, bx1 = make_linear(keys[1], seq_len, C)
    wm1, bm1 = make_linear(keys[2], seq_len, C4)
    ws1, bs1 = make_linear(keys[3], seq_len, C4)
    wx2, bx2 = make_linear(keys[4], C, pred_len)
    wm2, bm2 = make_linear(keys[5], C4, pred_len)
    ws2, bs2 = make_linear(keys[6], C4, pred_len)
    wo1, bo1 = make_linear(keys[7], pred_len, C)
    wo2, bo2 = make_linear(keys[8], C, pred_len)
    params = (wx1, bx1, wx2, bx2, wm1, bm1, wm2, bm2,
              ws1, bs1, ws2, bs2, wo1, bo1, wo2, bo2)

    trend_k, ssnl_k = decompose_sizes(seq_len)
    A_t = avg_pool_matrix(seq_len, trend_k)
    A_s = avg_pool_matrix(seq_len, ssnl_k)

    w_slab, b_slab, offs = build_folded_slabs(
        params, A_t, A_s, seq_len, pred_len, d_model)

    # main run: whole batch (B=32) in a single grid step
    out = jax.block_until_ready(
        decom_linear_forward(x, w_slab, b_slab, offs, pred_len))
    assert out.shape == (B, pred_len)

    # (1) vs exact f32 module semantics — tolerance covers bf16 quantization
    ref = jax.block_until_ready(reference_forward(x, A_t, A_s, params))
    assert jnp.allclose(out, ref, rtol=3e-2, atol=3e-2), "mismatch vs f32 reference"

    # (2) vs plain-jnp mirror of the folded bf16 math — tight plumbing check
    ref_folded = jax.block_until_ready(
        folded_reference(x, w_slab, b_slab, offs, pred_len))
    assert jnp.allclose(out, ref_folded, rtol=1e-3, atol=1e-3), \
        "mismatch vs folded bf16 reference"

    # (3) padding path: B not a multiple of 8
    out_small = jax.block_until_ready(
        decom_linear_forward(x[:20], w_slab, b_slab, offs, pred_len))
    assert out_small.shape == (20, pred_len)
    assert jnp.allclose(out_small, ref[:20], rtol=3e-2, atol=3e-2), \
        "mismatch on padded-batch path"

    # (4) multi-tile grid path (correctness only; perf config uses one tile)
    out_tiled = jax.block_until_ready(
        decom_linear_forward(x, w_slab, b_slab, offs, pred_len, block_b=16))
    assert jnp.allclose(out_tiled, out, rtol=1e-6, atol=1e-6), \
        "mismatch between single-tile and multi-tile grids"

    # TODO(synk): training-loss branch (y is not None) of Model.forward and the
    # 3-D-input branch of moving_avg are not implemented; this kernel covers
    # the 2-D inference forward path only.
    print("KERNEL_OK")
</pallas_src>

<mosaic_0001>
module attributes {stable_mosaic.version = 11 : i64} {
  func.func @kernel(%arg0: i32, %arg1: memref<32x16xf32, #tpu.memory_space<vmem>>, %arg2: memref<272x128xbf16, #tpu.memory_space<vmem>>, %arg3: memref<8x128xf32, #tpu.memory_space<vmem>>, %arg4: memref<32x128xf32, #tpu.memory_space<vmem>>) attributes {dimension_semantics = [#tpu.dimension_semantics<parallel>], iteration_bounds = array<i64: 1>, scalar_prefetch = 0 : i64, scratch_operands = 0 : i64, tpu.core_type = #tpu.core_type<tc>, window_params = [{transform_indices = @transform_0, window_bounds = array<i64: 32, 16>}, {pipeline_mode = #tpu.pipeline_mode<synchronous>, transform_indices = @transform_1, window_bounds = array<i64: 272, 128>}, {pipeline_mode = #tpu.pipeline_mode<synchronous>, transform_indices = @transform_2, window_bounds = array<i64: 8, 128>}, {transform_indices = @transform_3, window_bounds = array<i64: 32, 128>}]} {
    %c0 = arith.constant 0 : index
    %c0_0 = arith.constant 0 : index
    %0 = vector.load %arg1[%c0, %c0_0] : memref<32x16xf32, #tpu.memory_space<vmem>>, vector<32x16xf32>
    %1 = arith.truncf %0 : vector<32x16xf32> to vector<32x16xbf16>
    %c0_1 = arith.constant 0 : index
    %c0_2 = arith.constant 0 : index
    %2 = vector.load %arg2[%c0_1, %c0_2] : memref<272x128xbf16, #tpu.memory_space<vmem>>, vector<16x128xbf16>
    %cst = arith.constant dense<0.000000e+00> : vector<32x128xf32>
    %3 = tpu.matmul %1, %2, %cst {dimension_numbers = #tpu.dot_dimension_numbers<[1], [0], [0], [1], [0, 0, 1, 1], [], []>} : vector<32x16xbf16>, vector<16x128xbf16>, vector<32x128xf32> -> vector<32x128xf32>
    %c0_3 = arith.constant 0 : index
    %c0_4 = arith.constant 0 : index
    %4 = vector.load %arg3[%c0_3, %c0_4] : memref<8x128xf32, #tpu.memory_space<vmem>>, vector<1x128xf32>
    %5 = vector.broadcast %4 : vector<1x128xf32> to vector<32x128xf32>
    %6 = arith.addf %3, %5 : vector<32x128xf32>
    %cst_5 = arith.constant 0.000000e+00 : f32
    %7 = vector.broadcast %cst_5 : f32 to vector<32x128xf32>
    %8 = arith.maximumf %6, %7 : vector<32x128xf32>
    %9 = arith.truncf %8 : vector<32x128xf32> to vector<32x128xbf16>
    %c16 = arith.constant 16 : index
    %c0_6 = arith.constant 0 : index
    %10 = vector.load %arg2[%c16, %c0_6] : memref<272x128xbf16, #tpu.memory_space<vmem>>, vector<128x128xbf16>
    %cst_7 = arith.constant dense<0.000000e+00> : vector<32x128xf32>
    %11 = tpu.matmul %9, %10, %cst_7 {dimension_numbers = #tpu.dot_dimension_numbers<[1], [0], [0], [1], [0, 0, 1, 1], [], []>} : vector<32x128xbf16>, vector<128x128xbf16>, vector<32x128xf32> -> vector<32x128xf32>
    %c1 = arith.constant 1 : index
    %c0_8 = arith.constant 0 : index
    %12 = vector.load %arg3[%c1, %c0_8] : memref<8x128xf32, #tpu.memory_space<vmem>>, vector<1x128xf32>
    %13 = vector.broadcast %12 : vector<1x128xf32> to vector<32x128xf32>
    %14 = arith.addf %11, %13 : vector<32x128xf32>
    %cst_9 = arith.constant 0.000000e+00 : f32
    %15 = vector.broadcast %cst_9 : f32 to vector<32x128xf32>
    %16 = arith.maximumf %14, %15 : vector<32x128xf32>
    %17 = arith.truncf %16 : vector<32x128xf32> to vector<32x128xbf16>
    %c144 = arith.constant 144 : index
    %c0_10 = arith.constant 0 : index
    %18 = vector.load %arg2[%c144, %c0_10] : memref<272x128xbf16, #tpu.memory_space<vmem>>, vector<128x128xbf16>
    %cst_11 = arith.constant dense<0.000000e+00> : vector<32x128xf32>
    %19 = tpu.matmul %17, %18, %cst_11 {dimension_numbers = #tpu.dot_dimension_numbers<[1], [0], [0], [1], [0, 0, 1, 1], [], []>} : vector<32x128xbf16>, vector<128x128xbf16>, vector<32x128xf32> -> vector<32x128xf32>
    %c2 = arith.constant 2 : index
    %c0_12 = arith.constant 0 : index
    %20 = vector.load %arg3[%c2, %c0_12] : memref<8x128xf32, #tpu.memory_space<vmem>>, vector<1x128xf32>
    %21 = vector.broadcast %20 : vector<1x128xf32> to vector<32x128xf32>
    %22 = arith.addf %19, %21 : vector<32x128xf32>
    %c0_13 = arith.constant 0 : index
    %c0_14 = arith.constant 0 : index
    %23 = vector.load %arg4[%c0_13, %c0_14] : memref<32x128xf32, #tpu.memory_space<vmem>>, vector<32x128xf32>
    tpu.vector_store %arg4[%c0_13, %c0_14], %22 {strides = array<i32>} : memref<32x128xf32, #tpu.memory_space<vmem>>, vector<32x128xf32>,
    return
  }
  func.func @transform_0(%arg0: i32) -> (i32, i32) {
    %c0_i32 = arith.constant 0 : i32
    %c0_i32_0 = arith.constant 0 : i32
    return %arg0, %c0_i32 : i32, i32
  }
  func.func @transform_1(%arg0: i32) -> (i32, i32) {
    %c0_i32 = arith.constant 0 : i32
    %c0_i32_0 = arith.constant 0 : i32
    %c0_i32_1 = arith.constant 0 : i32
    return %c0_i32, %c0_i32_0 : i32, i32
  }
  func.func @transform_2(%arg0: i32) -> (i32, i32) {
    %c0_i32 = arith.constant 0 : i32
    %c0_i32_0 = arith.constant 0 : i32
    %c0_i32_1 = arith.constant 0 : i32
    return %c0_i32, %c0_i32_0 : i32, i32
  }
  func.func @transform_3(%arg0: i32) -> (i32, i32) {
    %c0_i32 = arith.constant 0 : i32
    %c0_i32_0 = arith.constant 0 : i32
    return %arg0, %c0_i32 : i32, i32
  }
}

</mosaic_0001>

<bundles_post_ra>
// kernel: tpu_custom_call.1
= control target key start
LH: loop header
LB: loop body
LE: loop exit
PB: predicated region body
PF: predicated region fallthrough
CT: control target
= control target key end

     0   :  { %8 = vsyncpa [#allocation3], 0  ;;  %s607_s0 = inlined_call_operand.vmem [shape: f32[32,16], index: 0, kind: input, shape index: {}]   ;;  %s608_s1 = inlined_call_operand.hbm [shape: bf16[272,128], index: 1, kind: input, shape index: {}]   ;;  %s609_s2 = inlined_call_operand.vmem [shape: f32[8,128], index: 2, kind: input, shape index: {}]   ;;  %s610_s3 = inlined_call_operand.hbm [shape: f32[32,128], index: 3, kind: output, shape index: {}]  }
   0x1   :  { %9 = vsyncpa [#allocation4], 0  ;;  %s536_s12 = smov [#allocation2]   ;;  %s488_s16 = scalar_lea.hbm %s608_s1, 2176 }
   0x2   :  { %s17_s13 = sshll.u32 %s536_s12, 4  ;;  %p489_p0 = scmp.ne.s32.totalorder %s608_s1, %s488_s16  ;;  %s18_s13 = int_to_ptr.vmem [resolvable:$true] %s17_s13 }
   0x3   :  { %p492_p1 = scmp.lt.u32.totalorder %s488_s16, %s608_s1 }
   0x5   :  { %p494_p2 = pnand %p492_p1, %p489_p0 }
   0x7   :  { %497 = shalt.err (!%p494_p2)
}
   0x8   :  { %s498_s21 = scalar_lea.vmem %s18_s13, 2176  ;;  %p503_p4 = scmp.lt.s32.totalorder %s18_s13, %s18_s13 }
   0x9   :  { %p499_p3 = scmp.ne.s32.totalorder %s18_s13, %s498_s21  ;;  %p504_p5 = scmp.lt.s32.totalorder %s498_s21, %s498_s21 }
   0xb   :  { %p505_p6 = por %p504_p5, %p503_p4 }
   0xd   :  { %p506_p7 = pnand %p505_p6, %p499_p3 }
   0xf   :  { %509 = shalt.err (!%p506_p7)
}
  0x10   :  { %s537_s22 = smov 64   ;;  %s538_s23 = smov 4  }
  0x11   :  { %23 = dma.hbm_to_vmem [thread:$0]  %s608_s1, 2176, %s18_s13, [#allocation3], %s537_s22, %s537_s22, %s538_s23  }
  0x12   :  { %532 = dma.done.wait [#allocation3], 2176  }
  0x13   :  { %533 = vsyncadd [#allocation3], 4294965120  ;;  %v471_v0 = vld [vmem:[#allocation2] sm:$0xff]   ;;  %v31_v2 = vld [vmem:[%s607_s0 + $0x8] sm:$0xff]  ;;  %vm49_vm0 = vcmask 130048   ;;  %s539_s11 = smov [#allocation5]  }
  0x14   :  { %v30_v1 = vld [vmem:[%s607_s0] sm:$0xff]  ;;  %v32_v3 = vld [vmem:[%s607_s0 + $0x10] sm:$0xff]  ;;  %419 = vmatprep.subr.bf16.mxu0 %v471_v0  ;;  %v33_v5 = vld [vmem:[%s607_s0 + $0x18] sm:$0xff]  ;;  %s362_s12 = sshll.u32 %s539_s11, 4  ;;  %s363_s12 = int_to_ptr.vmem [resolvable:$true] %s362_s12 }
  0x15   :  { %v34_v4 = vpack.c.bf16 %v31_v2, %v30_v1  ;;  %420 = vmatpush3.bf16.msra.mxu0 %v471_v0  ;;  %v35_v6 = vpack.c.bf16 %v33_v5, %v32_v3  ;;  %v472_v7 = vld [vmem:[#allocation2 + $0x8] sm:$0xff]   ;;  %v473_v8 = vld [vmem:[#allocation2 + $0x10] sm:$0xff]   ;;  %v474_v9 = vld [vmem:[#allocation2 + $0x18] sm:$0xff]   ;;  %s510_s13 = scalar_lea.vmem %s363_s12, 512  ;;  %p515_p9 = scmp.lt.s32.totalorder %s363_s12, %s363_s12 }
  0x16   :  { %425 = vmatprep.subr.bf16.mxu1 %v472_v7  ;;  %v475_v10 = vld [vmem:[#allocation2 + $0x20] sm:$0xff]   ;;  %v476_v11 = vld [vmem:[#allocation2 + $0x28] sm:$0xff]   ;;  %v477_v12 = vld [vmem:[#allocation2 + $0x30] sm:$0xff]   ;;  %p511_p8 = scmp.ne.s32.totalorder %s363_s12, %s510_s13  ;;  %p516_p10 = scmp.lt.s32.totalorder %s510_s13, %s510_s13 }
  0x17   :  { %421 = vmatprep.mubr.msk.bf16.mxu0 %vm49_vm0, %v34_v4  ;;  %426 = vmatpush3.bf16.msra.mxu1 %v472_v7  ;;  %v478_v13 = vld [vmem:[#allocation2 + $0x38] sm:$0xff]   ;;  %v479_v14 = vld [vmem:[#allocation2 + $0x40] sm:$0xff]   ;;  %v480_v15 = vld [vmem:[#allocation2 + $0x48] sm:$0xff]  }
  0x18   :  { %422 = vmatmul.mubr.msk.bf16.vlgmr.msra.gmra.mrb[0].mxu0 %vm49_vm0, %v35_v6  ;;  %427 = vmatprep.subr.bf16.mxu1 %v473_v8  ;;  %v481_v16 = vld [vmem:[#allocation2 + $0x50] sm:$0xff]   ;;  %v482_v17 = vld [vmem:[#allocation2 + $0x58] sm:$0xff]   ;;  %v483_v18 = vld [vmem:[#allocation2 + $0x60] sm:$0xff]   ;;  %p517_p11 = por %p516_p10, %p515_p9 }
  0x19   :  { %445 = vmatprep.subr.bf16.mxu0 %v480_v15  ;;  %v484_v19 = vld [vmem:[#allocation2 + $0x68] sm:$0xff]   ;;  %v485_v20 = vld [vmem:[#allocation2 + $0x70] sm:$0xff]   ;;  %v374_v21 = vld [vmem:[%s609_s2] ss:$0 sm:$0xff] }
  0x1a   :  { %446 = vmatpush3.bf16.msra.mxu0 %v480_v15  ;;  %v486_v36 = vld [vmem:[#allocation2 + $0x78] sm:$0xff]   ;;  %v487_v37 = vld [vmem:[#allocation2 + $0x80] sm:$0xff]   ;;  %p518_p12 = pnand %p517_p11, %p511_p8 }
  0x1b   :  { %428 = vmatpush3.bf16.msra.mxu1 %v473_v8  ;;  %447 = vmatprep.subr.bf16.mxu0 %v481_v16  ;;  %v378_v38 = vld [vmem:[%s609_s2 + $0x1] ss:$0 sm:$0xff]  ;;  %v387_v53 = vld [vmem:[%s609_s2 + $0x2] ss:$0 sm:$0xff] }
  0x1c   :  { %429 = vmatprep.subr.bf16.mxu1 %v474_v9 }
  0x1e   :  { %448 = vmatpush3.bf16.msra.mxu0 %v481_v16 }
  0x1f   :  { %430 = vmatpush3.bf16.msra.mxu1 %v474_v9  ;;  %449 = vmatprep.subr.bf16.mxu0 %v482_v17 }
  0x20   :  { %431 = vmatprep.subr.bf16.mxu1 %v475_v10 }
  0x22   :  { %450 = vmatpush3.bf16.msra.mxu0 %v482_v17 }
  0x23   :  { %432 = vmatpush3.bf16.msra.mxu1 %v475_v10  ;;  %451 = vmatprep.subr.bf16.mxu0 %v483_v18 }
  0x24   :  { %433 = vmatprep.subr.bf16.mxu1 %v476_v11 }
  0x26   :  { %452 = vmatpush3.bf16.msra.mxu0 %v483_v18 }
  0x27   :  { %434 = vmatpush3.bf16.msra.mxu1 %v476_v11  ;;  %453 = vmatprep.subr.bf16.mxu0 %v484_v19 }
  0x28   :  { %435 = vmatprep.subr.bf16.mxu1 %v477_v12 }
  0x2a   :  { %454 = vmatpush3.bf16.msra.mxu0 %v484_v19 }
  0x2b   :  { %436 = vmatpush3.bf16.msra.mxu1 %v477_v12  ;;  %455 = vmatprep.subr.bf16.mxu0 %v485_v20 }
  0x2c   :  { %437 = vmatprep.subr.bf16.mxu1 %v478_v13 }
  0x2e   :  { %456 = vmatpush3.bf16.msra.mxu0 %v485_v20 }
  0x2f   :  { %438 = vmatpush3.bf16.msra.mxu1 %v478_v13  ;;  %457 = vmatprep.subr.bf16.mxu0 %v486_v36 }
  0x30   :  { %439 = vmatprep.subr.bf16.mxu1 %v479_v14 }
  0x32   :  { %458 = vmatpush3.bf16.msra.mxu0 %v486_v36 }
  0x33   :  { %440 = vmatpush3.bf16.msra.mxu1 %v479_v14  ;;  %459 = vmatprep.subr.bf16.mxu0 %v487_v37 }
  0x36   :  { %460 = vmatpush3.bf16.msra.mxu0 %v487_v37 }
  0xeb   :  { %v423_v22 = vpop.f32.mrb[0].mxu0 }
  0xec   :  { %v99_v23 = vadd.f32 %v423_v22, %v374_v21  ;;  %v90_v24 = vpop.f32.mrb[1].mxu0 }
  0xed   :  { %v91_v25 = vadd.f32 %v374_v21, %v90_v24  ;;  %v424_v26 = vpop.f32.mrb[2].mxu0 }
  0xee   :  { %v102_v27 = vadd.f32 %v424_v26, %v374_v21  ;;  %v93_v28 = vpop.f32.mrb[3].mxu0  ;;  %v107_v30 = vmax.f32 %v99_v23, 0.0 }
  0xef   :  { %v94_v29 = vadd.f32 %v374_v21, %v93_v28  ;;  %v105_v32 = vmax.f32 %v91_v25, 0.0 }
  0xf0   :  { %v108_v31 = vmax.f32 %v102_v27, 0.0 }
  0xf1   :  { %v106_v33 = vmax.f32 %v94_v29, 0.0 }
  0xf2   :  { %v110_v34 = vpack.c.bf16 %v108_v31, %v107_v30 }
  0xf3   :  { %v109_v35 = vpack.c.bf16 %v106_v33, %v105_v32 }
  0xf5   :  { %441 = vmatprep.mubr.bf16.mxu1 %v109_v35 }
  0xf6   :  { %442 = vmatmul.mubr.bf16.vlgmr.msra.gmra.mrb[0].mxu1 %v110_v34 }
 0x1c9   :  { %v443_v39 = vpop.f32.mrb[0].mxu1 }
 0x1ca   :  { %v223_v40 = vadd.f32 %v443_v39, %v378_v38  ;;  %v214_v41 = vpop.f32.mrb[1].mxu1 }
 0x1cb   :  { %v215_v42 = vadd.f32 %v378_v38, %v214_v41  ;;  %v444_v43 = vpop.f32.mrb[2].mxu1 }
 0x1cc   :  { %v226_v44 = vadd.f32 %v444_v43, %v378_v38  ;;  %v217_v45 = vpop.f32.mrb[3].mxu1  ;;  %v231_v47 = vmax.f32 %v223_v40, 0.0 }
 0x1cd   :  { %v218_v46 = vadd.f32 %v378_v38, %v217_v45  ;;  %v229_v49 = vmax.f32 %v215_v42, 0.0 }
 0x1ce   :  { %v232_v48 = vmax.f32 %v226_v44, 0.0 }
 0x1cf   :  { %v230_v50 = vmax.f32 %v218_v46, 0.0 }
 0x1d0   :  { %v234_v51 = vpack.c.bf16 %v232_v48, %v231_v47 }
 0x1d1   :  { %v233_v52 = vpack.c.bf16 %v230_v50, %v229_v49 }
 0x1d3   :  { %461 = vmatprep.mubr.bf16.mxu0 %v233_v52 }
 0x1d4   :  { %462 = vmatmul.mubr.bf16.vlgmr.msra.gmra.mrb[4].mxu0 %v234_v51 }
 0x2a7   :  { %v463_v54 = vpop.f32.mrb[4].mxu0 }
 0x2a8   :  { %v347_v55 = vadd.f32 %v463_v54, %v387_v53  ;;  %v338_v56 = vpop.f32.mrb[5].mxu0 }
 0x2a9   :  { %v339_v57 = vadd.f32 %v387_v53, %v338_v56  ;;  %v464_v58 = vpop.f32.mrb[6].mxu0 }
 0x2aa   :  { %355 = vst [vmem:[#allocation5 + $0x10] sm:$0xff] %v347_v55  ;;  %v350_v59 = vadd.f32 %v464_v58, %v387_v53  ;;  %v341_v60 = vpop.f32.mrb[7].mxu0 }
 0x2ab   :  { %353 = vst [vmem:[#allocation5] sm:$0xff] %v339_v57  ;;  %v342_v61 = vadd.f32 %v387_v53, %v341_v60 }
 0x2ac   :  { %356 = vst [vmem:[#allocation5 + $0x18] sm:$0xff] %v350_v59 }
 0x2ad   :  { %354 = vst [vmem:[#allocation5 + $0x8] sm:$0xff] %v342_v61 }
 0x2ae   :  { %521 = shalt.err (!%p518_p12)
}
 0x2af   :  { %s522_s15 = scalar_lea.hbm %s610_s3, 512 }
 0x2b0   :  { %p523_p13 = scmp.ne.s32.totalorder %s610_s3, %s522_s15  ;;  %p526_p0 = scmp.lt.u32.totalorder %s522_s15, %s610_s3 }
 0x2b2   :  { %p528_p1 = pnand %p526_p0, %p523_p13 }
 0x2b4   :  { %531 = shalt.err (!%p528_p1)
}
 0x2b5   :  { %s540_s20 = smov 128   ;;  %s541_s21 = smov 8  }
 0x2b6   :  { %368 = dma.vmem_to_hbm [thread:$0]  %s363_s12, 512, %s610_s3, [#allocation4], %s540_s20, %s540_s20, %s541_s21  }
 0x2b7   :  { %534 = dma.done.wait [#allocation4], 512  }
 0x2b8   :  { %535 = vsyncadd [#allocation4], 4294966784 }
 0x2b9   :  { %372 = vsyncpa [#allocation3], 1 }
 0x2ba   :  { %373 = vsyncpa [#allocation4], 1 }

</bundles_post_ra>
